<compile_context>
chip_gen: v5e
topology: v5e:2x2
jax: 0.10.0
libtpu: 0.0.40
codegen_flags: <defaults>
</compile_context>

<pallas_src>
import functools

import jax
import jax.numpy as jnp
from jax.experimental import pallas as pl
from jax.experimental.pallas import tpu as pltpu

_EPS = 1e-5
_LANE = 128
# Conservative scoped-VMEM limit, safe on v5e/v6e/v7x; tiles here are far below it.
_VMEM_LIMIT = 32 * 1024 * 1024


def _round_up(x, m):
    return (x + m - 1) // m * m


def _cparams(dims):
    return pltpu.CompilerParams(dimension_semantics=dims,
                                vmem_limit_bytes=_VMEM_LIMIT)


def _pick_tb(n, rows_per_image, bytes_per_image,
             target_rows=256, max_bytes=8 * 1024 * 1024):
    """Batch-tile: smallest divisor of n giving >= 256 MXU rows, VMEM-capped."""
    best = 1
    for d in range(1, n + 1):
        if n % d:
            continue
        if d > 1 and d * bytes_per_image > max_bytes:
            break
        best = d
        if best * rows_per_image >= target_rows:
            break
    return best


# ---------------------------------------------------------------------------
# Kernels
# ---------------------------------------------------------------------------
def _bn_stats_kernel(x_ref, gamma_ref, beta_ref, sb_ref, *, m_true, eps):
    """Per-channel batch statistics -> affine (scale, bias), tiled over rows."""
    i = pl.program_id(0)

    @pl.when(i == 0)
    def _():
        sb_ref[...] = jnp.zeros(sb_ref.shape, sb_ref.dtype)

    x = x_ref[...].astype(jnp.float32)
    s = jnp.sum(x, axis=0, keepdims=True)
    ss = jnp.sum(x * x, axis=0, keepdims=True)
    sb_ref[...] += jnp.concatenate([s, ss], axis=0)

    @pl.when(i == pl.num_programs(0) - 1)
    def _():
        mean = sb_ref[0:1, :] / m_true
        var = sb_ref[1:2, :] / m_true - mean * mean   # single-pass variance (f32)
        var = jnp.maximum(var, 0.0)                   # guard tiny negative values
        inv = jax.lax.rsqrt(var + eps)                # EUP rsqrt
        scale = gamma_ref[...] * inv
        bias = beta_ref[...] - mean * scale
        sb_ref[...] = jnp.concatenate([scale, bias], axis=0)


def _conv3x3_kernel(x_ref, sb_ref, w_ref, *rest, stride, ho, wo, residual):
    """Fused relu(bn(x)) -> zero-pad halo (VMEM scratch) -> 3x3 conv (+ residual).

    All 9 taps are unrolled in the body: each is an MXU dot of the shifted
    (tb*ho*wo, Cin) window against the (Cin, Cout) filter slice with f32
    accumulation.  The filter bank has a constant index_map so it is fetched
    from HBM once and stays resident across the grid.
    """
    if residual == "raw":
        res_ref, o_ref, pad_ref = rest
        res_sb_ref = None
    elif residual == "bnrelu":
        res_ref, res_sb_ref, o_ref, pad_ref = rest
    else:
        (o_ref, pad_ref) = rest
        res_ref = res_sb_ref = None

    tb, hin, win, cin = x_ref.shape
    cout = o_ref.shape[-1]

    # Fused pre-activation: relu(x * scale + bias) in f32.
    scale = sb_ref[0:1, :].reshape(1, 1, 1, cin)
    bias = sb_ref[1:2, :].reshape(1, 1, 1, cin)
    hv = jnp.maximum(x_ref[...].astype(jnp.float32) * scale + bias, 0.0)

    # Spatial zero-padding halo lives entirely in a VMEM scratch (no HBM pads).
    pad_ref[...] = jnp.zeros(pad_ref.shape, pad_ref.dtype)
    pad_ref[:, pl.ds(1, hin), pl.ds(1, win), :] = hv

    rows = tb * ho * wo
    acc = jnp.zeros((rows, cout), jnp.float32)
    for dy in range(3):
        for dx in range(3):
            if stride == 1:
                tap = pad_ref[:, pl.ds(dy, ho), pl.ds(dx, wo), :]
            else:
                # TODO(synk): pre-compacting even/odd columns would avoid the
                # strided sublane reads for the stride-2 conv1 path.
                tap = pad_ref[:, pl.ds(dy, ho, stride=stride),
                              pl.ds(dx, wo, stride=stride), :]
            lhs = tap.reshape(rows, cin).astype(w_ref.dtype)   # MXU dtype (bf16/f32)
            acc = acc + jnp.dot(lhs, w_ref[dy, dx, :, :],
                                preferred_element_type=jnp.float32)
    out = acc.reshape(tb, ho, wo, cout)

    if residual == "raw":
        out = out + res_ref[...].astype(jnp.float32)
    elif residual == "bnrelu":
        # Identity shortcut: recompute relu(bn1(x)) in f32 and add (no bf16
        # rounding of the residual, no materialized activation in HBM).
        r_scale = res_sb_ref[0:1, :].reshape(1, 1, 1, cout)
        r_bias = res_sb_ref[1:2, :].reshape(1, 1, 1, cout)
        rv = res_ref[...].astype(jnp.float32)
        out = out + jnp.maximum(rv * r_scale + r_bias, 0.0)

    o_ref[...] = out.astype(o_ref.dtype)


def _shortcut_kernel(x_ref, sb_ref, w_ref, o_ref):
    """Projection shortcut: fused relu(bn1(x)) prologue + 1x1 conv (matmul)."""
    tb, ho, wo, cin = x_ref.shape
    cout = o_ref.shape[-1]
    scale = sb_ref[0:1, :].reshape(1, 1, 1, cin)
    bias = sb_ref[1:2, :].reshape(1, 1, 1, cin)
    hv = jnp.maximum(x_ref[...].astype(jnp.float32) * scale + bias, 0.0)
    hv = hv.astype(w_ref.dtype)
    out = jnp.dot(hv.reshape(tb * ho * wo, cin), w_ref[...],
                  preferred_element_type=jnp.float32)
    o_ref[...] = out.reshape(tb, ho, wo, cout).astype(o_ref.dtype)


# ---------------------------------------------------------------------------
# pallas_call wrappers
# ---------------------------------------------------------------------------
def _pad_rows(x2d, tm):
    m = x2d.shape[0]
    mp = _round_up(m, tm)
    if mp != m:
        x2d = jnp.pad(x2d, ((0, mp - m), (0, 0)))   # zero rows don't affect sums
    return x2d


def bn_scale_bias(x2d, gamma, beta, *, eps=_EPS, tm=512):
    m, c = x2d.shape
    tm = min(tm, _round_up(m, 8))
    xp = _pad_rows(x2d, tm)
    grid = (xp.shape[0] // tm,)
    kern = functools.partial(_bn_stats_kernel, m_true=float(m), eps=eps)
    # TODO(synk): on v7x (2 TCs) a parallel channel-split of this reduction would
    # engage both cores; channel counts here fit a single lane tile.
    return pl.pallas_call(
        kern,
        grid=grid,
        in_specs=[pl.BlockSpec((tm, c), lambda i: (i, 0)),
                  pl.BlockSpec((1, c), lambda i: (0, 0)),
                  pl.BlockSpec((1, c), lambda i: (0, 0))],
        out_specs=pl.BlockSpec((2, c), lambda i: (0, 0)),
        out_shape=jax.ShapeDtypeStruct((2, c), jnp.float32),
        compiler_params=_cparams(("arbitrary",)),
    )(xp, gamma.reshape(1, c), beta.reshape(1, c))


def conv3x3_fused(x, sb, w_mat, *, stride, residual=None, res=None, res_sb=None,
                  out_dtype=jnp.float32, tb=None):
    n, h, w_in, cin_p = x.shape
    cout_p = w_mat.shape[-1]
    ho = (h - 1) // stride + 1
    wo = (w_in - 1) // stride + 1
    if tb is None:
        tb = _pick_tb(n, ho * wo, h * w_in * cin_p * x.dtype.itemsize)
    grid = (n // tb,)

    in_specs = [
        pl.BlockSpec((tb, h, w_in, cin_p), lambda bi: (bi, 0, 0, 0)),
        pl.BlockSpec((2, cin_p), lambda bi: (0, 0)),
        # Full filter bank, constant block index -> DMA'd once, VMEM-resident.
        pl.BlockSpec((3, 3, cin_p, cout_p), lambda bi: (0, 0, 0, 0)),
    ]
    args = [x, sb, w_mat]
    if residual == "raw":
        in_specs.append(pl.BlockSpec((tb, ho, wo, cout_p), lambda bi: (bi, 0, 0, 0)))
        args.append(res)
    elif residual == "bnrelu":
        in_specs.append(pl.BlockSpec((tb, ho, wo, cout_p), lambda bi: (bi, 0, 0, 0)))
        in_specs.append(pl.BlockSpec((2, cout_p), lambda bi: (0, 0)))
        args += [res, res_sb]

    kern = functools.partial(_conv3x3_kernel, stride=stride, ho=ho, wo=wo,
                             residual=residual)
    return pl.pallas_call(
        kern,
        grid=grid,
        in_specs=in_specs,
        out_specs=pl.BlockSpec((tb, ho, wo, cout_p), lambda bi: (bi, 0, 0, 0)),
        out_shape=jax.ShapeDtypeStruct((n, ho, wo, cout_p), out_dtype),
        scratch_shapes=[pltpu.VMEM((tb, h + 2, w_in + 2, cin_p), jnp.float32)],
        compiler_params=_cparams(("parallel",)),
    )(*args)


def shortcut_1x1(x_s, sb, w_sc, *, out_dtype=jnp.float32, tb=None):
    n, ho, wo, cin_p = x_s.shape
    cout_p = w_sc.shape[-1]
    if tb is None:
        tb = _pick_tb(n, ho * wo, ho * wo * cin_p * x_s.dtype.itemsize)
    grid = (n // tb,)
    return pl.pallas_call(
        _shortcut_kernel,
        grid=grid,
        in_specs=[pl.BlockSpec((tb, ho, wo, cin_p), lambda bi: (bi, 0, 0, 0)),
                  pl.BlockSpec((2, cin_p), lambda bi: (0, 0)),
                  pl.BlockSpec((cin_p, cout_p), lambda bi: (0, 0))],
        out_specs=pl.BlockSpec((tb, ho, wo, cout_p), lambda bi: (bi, 0, 0, 0)),
        out_shape=jax.ShapeDtypeStruct((n, ho, wo, cout_p), out_dtype),
        compiler_params=_cparams(("parallel",)),
    )(x_s, sb, w_sc)


# ---------------------------------------------------------------------------
# Glue: layout transposes, channel padding, weight reshaping.
# ---------------------------------------------------------------------------
def _conv3_weight(w_oihw, cin_p, cout_p, dtype):
    co, ci, _, _ = w_oihw.shape
    wm = jnp.transpose(w_oihw, (2, 3, 1, 0))                       # (3,3,Cin,Cout)
    wm = jnp.pad(wm, ((0, 0), (0, 0), (0, cin_p - ci), (0, cout_p - co)))
    return wm.astype(dtype)


def _conv1_weight(w_oihw, cin_p, cout_p, dtype):
    co, ci, _, _ = w_oihw.shape
    wm = jnp.transpose(w_oihw, (2, 3, 1, 0)).reshape(ci, co)        # (Cin,Cout)
    wm = jnp.pad(wm, ((0, cin_p - ci), (0, cout_p - co)))
    return wm.astype(dtype)


def _pad_vec(v, cp):
    return jnp.pad(v.astype(jnp.float32), (0, cp - v.shape[0]))


def preact_block_forward(x_nchw, params, stride, *, compute_dtype=jnp.bfloat16):
    x = jnp.transpose(x_nchw, (0, 2, 3, 1)).astype(jnp.float32)     # NCHW -> NHWC
    n, h, w, cin = x.shape
    planes = params["conv1_w"].shape[0]
    cin_p = _round_up(cin, _LANE)
    cout_p = _round_up(planes, _LANE)
    ho = (h - 1) // stride + 1
    wo = (w - 1) // stride + 1
    has_projection = (stride != 1) or (cin != planes)

    x_p = jnp.pad(x, ((0, 0), (0, 0), (0, 0), (0, cin_p - cin)))

    # bn1 batch statistics -> per-channel (scale, bias)
    sb1 = bn_scale_bias(x_p.reshape(n * h * w, cin_p),
                        _pad_vec(params["bn1_gamma"], cin_p),
                        _pad_vec(params["bn1_beta"], cin_p))

    # conv1 with fused bn1+relu prologue and in-VMEM zero-pad halo.
    w1 = _conv3_weight(params["conv1_w"], cin_p, cout_p, compute_dtype)
    o1 = conv3x3_fused(x_p, sb1, w1, stride=stride, out_dtype=compute_dtype)

    # Shortcut.
    if has_projection:
        x_s = x_p if stride == 1 else x_p[:, ::stride, ::stride, :]
        w_sc = _conv1_weight(params["shortcut_w"], cin_p, cout_p, compute_dtype)
        sc = shortcut_1x1(x_s, sb1, w_sc, out_dtype=jnp.float32)
        res_kwargs = dict(residual="raw", res=sc)
    else:
        # Identity shortcut: relu(bn1(x)) is recomputed inside conv2's epilogue.
        res_kwargs = dict(residual="bnrelu", res=x_p, res_sb=sb1)

    # bn2 batch statistics over conv1's raw output.
    # TODO(synk): these partial sums could be fused into conv1's epilogue to
    # save one HBM read of o1.
    sb2 = bn_scale_bias(o1.reshape(n * ho * wo, cout_p),
                        _pad_vec(params["bn2_gamma"], cout_p),
                        _pad_vec(params["bn2_beta"], cout_p))

    # conv2 with fused bn2+relu prologue and fused residual-add epilogue.
    w2 = _conv3_weight(params["conv2_w"], cout_p, cout_p, compute_dtype)
    out = conv3x3_fused(o1, sb2, w2, stride=1, out_dtype=jnp.float32, **res_kwargs)

    out = out[:, :, :, :planes]
    return jnp.transpose(out, (0, 3, 1, 2))                         # NHWC -> NCHW


# ---------------------------------------------------------------------------
# Pure-JAX reference for validation.
# ---------------------------------------------------------------------------
def reference_forward(x_nchw, params, stride):
    x = jnp.transpose(x_nchw, (0, 2, 3, 1)).astype(jnp.float32)
    planes = params["conv1_w"].shape[0]
    cin = x.shape[-1]

    def bn_relu_ref(t, gamma, beta):
        mu = jnp.mean(t, axis=(0, 1, 2), keepdims=True)
        var = jnp.mean(jnp.square(t - mu), axis=(0, 1, 2), keepdims=True)
        return jnp.maximum((t - mu) / jnp.sqrt(var + _EPS) * gamma + beta, 0.0)

    def conv(t, w_oihw, s, pad):
        w_hwio = jnp.transpose(w_oihw, (2, 3, 1, 0))
        return jax.lax.conv_general_dilated(
            t, w_hwio, (s, s), [(pad, pad), (pad, pad)],
            dimension_numbers=("NHWC", "HWIO", "NHWC"),
            precision=jax.lax.Precision.HIGHEST)

    hh = bn_relu_ref(x, params["bn1_gamma"], params["bn1_beta"])
    if stride != 1 or cin != planes:
        sc = conv(hh, params["shortcut_w"], stride, 0)
    else:
        sc = hh
    o = conv(hh, params["conv1_w"], stride, 1)
    o = bn_relu_ref(o, params["bn2_gamma"], params["bn2_beta"])
    o = conv(o, params["conv2_w"], 1, 1)
    o = o + sc
    return jnp.transpose(o, (0, 3, 1, 2))


def init_params(key, in_planes, planes, stride):
    ks = jax.random.split(key, 7)
    params = {
        "conv1_w": 0.1 * jax.random.normal(ks[0], (planes, in_planes, 3, 3), jnp.float32),
        "conv2_w": 0.1 * jax.random.normal(ks[1], (planes, planes, 3, 3), jnp.float32),
        "bn1_gamma": 1.0 + 0.1 * jax.random.normal(ks[2], (in_planes,), jnp.float32),
        "bn1_beta": 0.1 * jax.random.normal(ks[3], (in_planes,), jnp.float32),
        "bn2_gamma": 1.0 + 0.1 * jax.random.normal(ks[4], (planes,), jnp.float32),
        "bn2_beta": 0.1 * jax.random.normal(ks[5], (planes,), jnp.float32),
    }
    if stride != 1 or in_planes != planes:
        params["shortcut_w"] = 0.1 * jax.random.normal(
            ks[6], (planes, in_planes, 1, 1), jnp.float32)
    return params


if __name__ == "__main__":
    key = jax.random.PRNGKey(0)
    N, H, W = 2, 16, 16
    configs = [
        # (in_planes, planes, stride, compute_dtype, rel-to-max tolerance)
        (4, 8, 1, jnp.bfloat16, 2e-2),   # projection (1x1 conv) shortcut, bf16 MXU
        (8, 8, 1, jnp.bfloat16, 2e-2),   # identity shortcut, bf16 MXU
        (4, 8, 1, jnp.float32, 1e-2),    # f32 path, tighter algorithmic check
    ]
    for idx, (cin, planes, stride, cdt, tol) in enumerate(configs):
        kx, kp, key = jax.random.split(key, 3)
        x = jax.random.normal(kx, (N, cin, H, W), jnp.float32)      # NCHW input
        params = init_params(kp, cin, planes, stride)

        out = jax.block_until_ready(
            preact_block_forward(x, params, stride, compute_dtype=cdt))
        ref = jax.block_until_ready(reference_forward(x, params, stride))

        ho = (H - 1) // stride + 1
        wo = (W - 1) // stride + 1
        assert out.shape == (N, planes, ho, wo), out.shape
        # Tolerance scaled to max|ref| (bf16 MXU inputs / bf16 intermediates);
        # any indexing / layout / statistics bug produces O(1) relative error.
        err = float(jnp.max(jnp.abs(out - ref)) / (jnp.max(jnp.abs(ref)) + 1e-6))
        assert err < tol, (idx, err)

    # TODO(synk): BatchNorm running-statistics (training-time buffer mutation /
    # eval-mode running stats) are not modeled; batch statistics are used for
    # normalization, matching PyTorch train-mode forward output.
    print("KERNEL_OK")
</pallas_src>

<mosaic_0001>
module attributes {stable_mosaic.version = 11 : i64} {
  func.func @_bn_stats_kernel(%arg0: i32, %arg1: memref<512x128xf32, #tpu.memory_space<vmem>>, %arg2: memref<1x128xf32, #tpu.memory_space<vmem>>, %arg3: memref<1x128xf32, #tpu.memory_space<vmem>>, %arg4: memref<2x128xf32, #tpu.memory_space<vmem>>) attributes {dimension_semantics = [#tpu.dimension_semantics<arbitrary>], iteration_bounds = array<i64: 1>, scalar_prefetch = 0 : i64, scratch_operands = 0 : i64, tpu.core_type = #tpu.core_type<tc>, window_params = [{transform_indices = @transform_0, window_bounds = array<i64: 512, 128>}, {pipeline_mode = #tpu.pipeline_mode<synchronous>, transform_indices = @transform_1, window_bounds = array<i64: 1, 128>}, {pipeline_mode = #tpu.pipeline_mode<synchronous>, transform_indices = @transform_2, window_bounds = array<i64: 1, 128>}, {pipeline_mode = #tpu.pipeline_mode<synchronous>, transform_indices = @transform_3, window_bounds = array<i64: 2, 128>}]} {
    %c0_i32 = arith.constant 0 : i32
    %0 = arith.cmpi eq, %arg0, %c0_i32 : i32
    %1 = arith.extui %0 : i1 to i32
    %c0_i32_0 = arith.constant 0 : i32
    %2 = arith.cmpi ne, %1, %c0_i32_0 : i32
    scf.if %2 {
      %cst_9 = arith.constant 0.000000e+00 : f32
      %16 = vector.broadcast %cst_9 : f32 to vector<2x128xf32>
      %c0_10 = arith.constant 0 : index
      %c0_11 = arith.constant 0 : index
      %17 = vector.load %arg4[%c0_10, %c0_11] : memref<2x128xf32, #tpu.memory_space<vmem>>, vector<2x128xf32>
      tpu.vector_store %arg4[%c0_10, %c0_11], %16 {strides = array<i32>} : memref<2x128xf32, #tpu.memory_space<vmem>>, vector<2x128xf32>,
    } else {
    }
    %c0 = arith.constant 0 : index
    %c0_1 = arith.constant 0 : index
    %3 = vector.load %arg1[%c0, %c0_1] : memref<512x128xf32, #tpu.memory_space<vmem>>, vector<512x128xf32>
    %cst = arith.constant dense<0.000000e+00> : vector<128xf32>
    %4 = vector.multi_reduction <add>, %3, %cst [0] : vector<512x128xf32> to vector<128xf32>
    %5 = vector.shape_cast %4 : vector<128xf32> to vector<1x128xf32>
    %6 = arith.mulf %3, %3 : vector<512x128xf32>
    %cst_2 = arith.constant dense<0.000000e+00> : vector<128xf32>
    %7 = vector.multi_reduction <add>, %6, %cst_2 [0] : vector<512x128xf32> to vector<128xf32>
    %8 = vector.shape_cast %7 : vector<128xf32> to vector<1x128xf32>
    %c0_3 = arith.constant 0 : index
    %c0_4 = arith.constant 0 : index
    %9 = vector.load %arg4[%c0_3, %c0_4] : memref<2x128xf32, #tpu.memory_space<vmem>>, vector<2x128xf32>
    %10 = tpu.concatenate %5, %8 in 0 : vector<1x128xf32>, vector<1x128xf32> -> vector<2x128xf32>
    %11 = arith.addf %9, %10 : vector<2x128xf32>
    %c0_5 = arith.constant 0 : index
    %c0_6 = arith.constant 0 : index
    %12 = vector.load %arg4[%c0_5, %c0_6] : memref<2x128xf32, #tpu.memory_space<vmem>>, vector<2x128xf32>
    tpu.vector_store %arg4[%c0_5, %c0_6], %11 {strides = array<i32>} : memref<2x128xf32, #tpu.memory_space<vmem>>, vector<2x128xf32>,
    %c0_i32_7 = arith.constant 0 : i32
    %13 = arith.cmpi eq, %arg0, %c0_i32_7 : i32
    %14 = arith.extui %13 : i1 to i32
    %c0_i32_8 = arith.constant 0 : i32
    %15 = arith.cmpi ne, %14, %c0_i32_8 : i32
    scf.if %15 {
      %c0_9 = arith.constant 0 : index
      %c0_10 = arith.constant 0 : index
      %16 = vector.load %arg4[%c0_9, %c0_10] : memref<2x128xf32, #tpu.memory_space<vmem>>, vector<1x128xf32>
      %cst_11 = arith.constant 5.120000e+02 : f32
      %17 = vector.broadcast %cst_11 : f32 to vector<1x128xf32>
      %18 = arith.divf %16, %17 : vector<1x128xf32>
      %c1 = arith.constant 1 : index
      %c0_12 = arith.constant 0 : index
      %19 = vector.load %arg4[%c1, %c0_12] : memref<2x128xf32, #tpu.memory_space<vmem>>, vector<1x128xf32>
      %cst_13 = arith.constant 5.120000e+02 : f32
      %20 = vector.broadcast %cst_13 : f32 to vector<1x128xf32>
      %21 = arith.divf %19, %20 : vector<1x128xf32>
      %22 = arith.mulf %18, %18 : vector<1x128xf32>
      %23 = arith.subf %21, %22 : vector<1x128xf32>
      %cst_14 = arith.constant 0.000000e+00 : f32
      %24 = vector.broadcast %cst_14 : f32 to vector<1x128xf32>
      %25 = arith.maximumf %23, %24 : vector<1x128xf32>
      %cst_15 = arith.constant 9.99999974E-6 : f32
      %26 = vector.broadcast %cst_15 : f32 to vector<1x128xf32>
      %27 = arith.addf %25, %26 : vector<1x128xf32>
      %28 = math.rsqrt %27 : vector<1x128xf32>
      %c0_16 = arith.constant 0 : index
      %c0_17 = arith.constant 0 : index
      %29 = vector.load %arg2[%c0_16, %c0_17] : memref<1x128xf32, #tpu.memory_space<vmem>>, vector<1x128xf32>
      %30 = arith.mulf %29, %28 : vector<1x128xf32>
      %c0_18 = arith.constant 0 : index
      %c0_19 = arith.constant 0 : index
      %31 = vector.load %arg3[%c0_18, %c0_19] : memref<1x128xf32, #tpu.memory_space<vmem>>, vector<1x128xf32>
      %32 = arith.mulf %18, %30 : vector<1x128xf32>
      %33 = arith.subf %31, %32 : vector<1x128xf32>
      %34 = tpu.concatenate %30, %33 in 0 : vector<1x128xf32>, vector<1x128xf32> -> vector<2x128xf32>
      %c0_20 = arith.constant 0 : index
      %c0_21 = arith.constant 0 : index
      %35 = vector.load %arg4[%c0_20, %c0_21] : memref<2x128xf32, #tpu.memory_space<vmem>>, vector<2x128xf32>
      tpu.vector_store %arg4[%c0_20, %c0_21], %34 {strides = array<i32>} : memref<2x128xf32, #tpu.memory_space<vmem>>, vector<2x128xf32>,
    } else {
    }
    return
  }
  func.func @transform_0(%arg0: i32) -> (i32, i32) {
    %c0_i32 = arith.constant 0 : i32
    %c0_i32_0 = arith.constant 0 : i32
    return %arg0, %c0_i32 : i32, i32
  }
  func.func @transform_1(%arg0: i32) -> (i32, i32) {
    %c0_i32 = arith.constant 0 : i32
    %c0_i32_0 = arith.constant 0 : i32
    %c0_i32_1 = arith.constant 0 : i32
    return %c0_i32, %c0_i32_0 : i32, i32
  }
  func.func @transform_2(%arg0: i32) -> (i32, i32) {
    %c0_i32 = arith.constant 0 : i32
    %c0_i32_0 = arith.constant 0 : i32
    %c0_i32_1 = arith.constant 0 : i32
    return %c0_i32, %c0_i32_0 : i32, i32
  }
  func.func @transform_3(%arg0: i32) -> (i32, i32) {
    %c0_i32 = arith.constant 0 : i32
    %c0_i32_0 = arith.constant 0 : i32
    %c0_i32_1 = arith.constant 0 : i32
    return %c0_i32, %c0_i32_0 : i32, i32
  }
}

</mosaic_0001>

<bundles_post_ra>
// kernel: tpu_custom_call.1
= control target key start
LH: loop header
LB: loop body
LE: loop exit
PB: predicated region body
PF: predicated region fallthrough
CT: control target
= control target key end

     0   :  { %8 = vsyncpa [#allocation3], 0  ;;  %s507_s0 = inlined_call_operand.hbm [shape: f32[512,128], index: 0, kind: input, shape index: {}]   ;;  %s508_s1 = inlined_call_operand.hbm [shape: f32[1,128], index: 1, kind: input, shape index: {}]   ;;  %s509_s2 = inlined_call_operand.vmem [shape: f32[1,128], index: 2, kind: input, shape index: {}]   ;;  %s510_s3 = inlined_call_operand.hbm [shape: f32[2,128], index: 3, kind: output, shape index: {}]  }
   0x1   :  { %9 = vsyncpa [#allocation6], 0 }
   0x2   :  { %10 = vsyncpa [#allocation4], 0  ;;  %s15_s14 = sshll.u32 %s507_s0, 4  ;;  %s466_s15 = smov [#allocation2]   ;;  %s16_s14 = int_to_ptr.hbm [resolvable:$true] %s15_s14 }
   0x3   :  { %s17_s16 = sshll.u32 %s466_s15, 4  ;;  %s29_s19 = sshll.u32 %s508_s1, 4  ;;  %s18_s16 = int_to_ptr.vmem [resolvable:$true] %s17_s16  ;;  %s30_s19 = int_to_ptr.hbm [resolvable:$true] %s29_s19 }
   0x4   :  { %s467_s20 = smov 128   ;;  %s468_s21 = smov 8  }
   0x5   :  { %23 = dma.hbm_to_vmem [thread:$0]  %s16_s14, 8192, %s18_s16, [#allocation3], %s467_s20, %s467_s20, %s468_s21  }
   0x6   :  { %s469_s22 = smov [#allocation5]  }
   0x7   :  { %s31_s23 = sshll.u32 %s469_s22, 4  ;;  %s32_s23 = int_to_ptr.vmem [resolvable:$true] %s31_s23 }
   0x8   :  { %34 = dma.hbm_to_vmem [thread:$0]  %s30_s19, 16, %s32_s23, [#allocation6]  }
   0x9   :  { %460 = dma.done.wait [#allocation3], 8192  }
   0xa   :  { %461 = vsyncadd [#allocation3], 4294959104 }
   0xb   :  { %462 = dma.done.wait [#allocation6], 16  }
   0xc   :  { %463 = vsyncadd [#allocation6], 4294967280  ;;  %v470_v0 = vmov 0.0   ;;  %v50_v1 = vld [vmem:[#allocation2] sm:$0xff]  ;;  %v51_v2 = vld [vmem:[#allocation2 + $0x8] sm:$0xff]  ;;  %vm317_vm0 = vcmask 1040384  }
   0xd   :  { %49 = vst [vmem:[#allocation7] sm:$0x3] %v470_v0  ;;  %v52_v3 = vld [vmem:[#allocation2 + $0x10] sm:$0xff]  ;;  %v53_v4 = vld [vmem:[#allocation2 + $0x18] sm:$0xff]  ;;  %v114_v5 = vadd.f32 %v51_v2, %v50_v1  ;;  %v183_v6 = vmul.f32 %v50_v1, %v50_v1  ;;  %v184_v7 = vmul.f32 %v51_v2, %v51_v2  ;;  %v54_v9 = vld [vmem:[#allocation2 + $0x20] sm:$0xff]  ;;  %s472_s24 = smov [#allocation7]  }
   0xe   :  { %v185_v8 = vmul.f32 %v52_v3, %v52_v3  ;;  %v186_v11 = vmul.f32 %v53_v4, %v53_v4  ;;  %v55_v13 = vld [vmem:[#allocation2 + $0x28] sm:$0xff]  ;;  %v187_v15 = vmul.f32 %v54_v9, %v54_v9  ;;  %v56_v17 = vld [vmem:[#allocation2 + $0x30] sm:$0xff]  ;;  %v57_v21 = vld [vmem:[#allocation2 + $0x38] sm:$0xff]  ;;  %s364_s25 = sshll.u32 %s472_s24, 4  ;;  %s366_s28 = sshll.u32 %s510_s3, 4  ;;  %s365_s25 = int_to_ptr.vmem [resolvable:$true] %s364_s25  ;;  %s367_s28 = int_to_ptr.hbm [resolvable:$true] %s366_s28 }
   0xf   :  { %v115_v10 = vadd.f32 %v114_v5, %v52_v3  ;;  %v247_v12 = vadd.f32 %v184_v7, %v183_v6  ;;  %v188_v19 = vmul.f32 %v55_v13, %v55_v13  ;;  %v189_v23 = vmul.f32 %v56_v17, %v56_v17  ;;  %v58_v25 = vld [vmem:[#allocation2 + $0x40] sm:$0xff]  ;;  %v59_v29 = vld [vmem:[#allocation2 + $0x48] sm:$0xff]  ;;  %v60_v33 = vld [vmem:[#allocation2 + $0x50] sm:$0xff] }
  0x10   :  { %v190_v27 = vmul.f32 %v57_v21, %v57_v21  ;;  %v191_v31 = vmul.f32 %v58_v25, %v58_v25  ;;  %v192_v35 = vmul.f32 %v59_v29, %v59_v29  ;;  %v61_v37 = vld [vmem:[#allocation2 + $0x58] sm:$0xff]  ;;  %v193_v39 = vmul.f32 %v60_v33, %v60_v33  ;;  %v62_v41 = vld [vmem:[#allocation2 + $0x60] sm:$0xff]  ;;  %v63_v45 = vld [vmem:[#allocation2 + $0x68] sm:$0xff] }
  0x11   :  { %v116_v14 = vadd.f32 %v115_v10, %v53_v4  ;;  %v248_v16 = vadd.f32 %v247_v12, %v185_v8  ;;  %v194_v43 = vmul.f32 %v61_v37, %v61_v37  ;;  %v195_v47 = vmul.f32 %v62_v41, %v62_v41  ;;  %v64_v49 = vld [vmem:[#allocation2 + $0x70] sm:$0xff]  ;;  %v65_v53 = vld [vmem:[#allocation2 + $0x78] sm:$0xff]  ;;  %v66_v57 = vld [vmem:[#allocation2 + $0x80] sm:$0xff] }
  0x12   :  { %v196_v51 = vmul.f32 %v63_v45, %v63_v45  ;;  %v197_v55 = vmul.f32 %v64_v49, %v64_v49  ;;  %v198_v59 = vmul.f32 %v65_v53, %v65_v53  ;;  %v67_v61 = vld [vmem:[#allocation2 + $0x88] sm:$0xff]  ;;  %v199_v63 = vmul.f32 %v66_v57, %v66_v57  ;;  %v68_v1 = vld [vmem:[#allocation2 + $0x90] sm:$0xff]  ;;  %v69_v5 = vld [vmem:[#allocation2 + $0x98] sm:$0xff] }
  0x13   :  { %v117_v18 = vadd.f32 %v116_v14, %v54_v9  ;;  %v249_v20 = vadd.f32 %v248_v16, %v186_v11  ;;  %v200_v3 = vmul.f32 %v67_v61, %v67_v61  ;;  %v201_v7 = vmul.f32 %v68_v1, %v68_v1  ;;  %v70_v9 = vld [vmem:[#allocation2 + $0xa0] sm:$0xff] }
  0x14   :  { %v202_v11 = vmul.f32 %v69_v5, %v69_v5 }
  0x15   :  { %v118_v22 = vadd.f32 %v117_v18, %v55_v13  ;;  %v250_v24 = vadd.f32 %v249_v20, %v187_v15  ;;  %v71_v13 = vld [vmem:[#allocation2 + $0xa8] sm:$0xff]  ;;  %v203_v15 = vmul.f32 %v70_v9, %v70_v9 }
  0x17   :  { %v119_v26 = vadd.f32 %v118_v22, %v56_v17  ;;  %v251_v28 = vadd.f32 %v250_v24, %v188_v19  ;;  %v72_v17 = vld [vmem:[#allocation2 + $0xb0] sm:$0xff]  ;;  %v204_v19 = vmul.f32 %v71_v13, %v71_v13 }
  0x19   :  { %v120_v30 = vadd.f32 %v119_v26, %v57_v21  ;;  %v252_v32 = vadd.f32 %v251_v28, %v189_v23  ;;  %v73_v21 = vld [vmem:[#allocation2 + $0xb8] sm:$0xff]  ;;  %v205_v23 = vmul.f32 %v72_v17, %v72_v17 }
  0x1b   :  { %v121_v34 = vadd.f32 %v120_v30, %v58_v25  ;;  %v253_v36 = vadd.f32 %v252_v32, %v190_v27  ;;  %v74_v25 = vld [vmem:[#allocation2 + $0xc0] sm:$0xff]  ;;  %v206_v27 = vmul.f32 %v73_v21, %v73_v21 }
  0x1d   :  { %v122_v38 = vadd.f32 %v121_v34, %v59_v29  ;;  %v254_v40 = vadd.f32 %v253_v36, %v191_v31  ;;  %v75_v29 = vld [vmem:[#allocation2 + $0xc8] sm:$0xff]  ;;  %v207_v31 = vmul.f32 %v74_v25, %v74_v25 }
  0x1f   :  { %v123_v42 = vadd.f32 %v122_v38, %v60_v33  ;;  %v255_v44 = vadd.f32 %v254_v40, %v192_v35  ;;  %v76_v33 = vld [vmem:[#allocation2 + $0xd0] sm:$0xff]  ;;  %v208_v35 = vmul.f32 %v75_v29, %v75_v29 }
  0x21   :  { %v124_v46 = vadd.f32 %v123_v42, %v61_v37  ;;  %v256_v48 = vadd.f32 %v255_v44, %v193_v39  ;;  %v77_v37 = vld [vmem:[#allocation2 + $0xd8] sm:$0xff]  ;;  %v209_v39 = vmul.f32 %v76_v33, %v76_v33 }
  0x23   :  { %v125_v50 = vadd.f32 %v124_v46, %v62_v41  ;;  %v257_v52 = vadd.f32 %v256_v48, %v194_v43  ;;  %v78_v41 = vld [vmem:[#allocation2 + $0xe0] sm:$0xff]  ;;  %v210_v43 = vmul.f32 %v77_v37, %v77_v37 }
  0x25   :  { %v126_v54 = vadd.f32 %v125_v50, %v63_v45  ;;  %v258_v56 = vadd.f32 %v257_v52, %v195_v47  ;;  %v79_v45 = vld [vmem:[#allocation2 + $0xe8] sm:$0xff]  ;;  %v211_v47 = vmul.f32 %v78_v41, %v78_v41 }
  0x27   :  { %v127_v58 = vadd.f32 %v126_v54, %v64_v49  ;;  %v259_v60 = vadd.f32 %v258_v56, %v196_v51  ;;  %v80_v49 = vld [vmem:[#allocation2 + $0xf0] sm:$0xff]  ;;  %v212_v51 = vmul.f32 %v79_v45, %v79_v45 }
  0x29   :  { %v128_v62 = vadd.f32 %v127_v58, %v65_v53  ;;  %v260_v0 = vadd.f32 %v259_v60, %v197_v55  ;;  %v81_v53 = vld [vmem:[#allocation2 + $0xf8] sm:$0xff]  ;;  %v213_v55 = vmul.f32 %v80_v49, %v80_v49 }
  0x2b   :  { %v129_v2 = vadd.f32 %v128_v62, %v66_v57  ;;  %v261_v4 = vadd.f32 %v260_v0, %v198_v59  ;;  %v82_v57 = vld [vmem:[#allocation2 + $0x100] sm:$0xff]  ;;  %v214_v59 = vmul.f32 %v81_v53, %v81_v53 }
  0x2d   :  { %v130_v6 = vadd.f32 %v129_v2, %v67_v61  ;;  %v262_v8 = vadd.f32 %v261_v4, %v199_v63  ;;  %v83_v61 = vld [vmem:[#allocation2 + $0x108] sm:$0xff]  ;;  %v215_v63 = vmul.f32 %v82_v57, %v82_v57 }
  0x2f   :  { %v131_v10 = vadd.f32 %v130_v6, %v68_v1  ;;  %v263_v12 = vadd.f32 %v262_v8, %v200_v3  ;;  %v84_v1 = vld [vmem:[#allocation2 + $0x110] sm:$0xff]  ;;  %v216_v3 = vmul.f32 %v83_v61, %v83_v61 }
  0x31   :  { %v132_v14 = vadd.f32 %v131_v10, %v69_v5  ;;  %v264_v16 = vadd.f32 %v263_v12, %v201_v7  ;;  %v85_v5 = vld [vmem:[#allocation2 + $0x118] sm:$0xff]  ;;  %v217_v7 = vmul.f32 %v84_v1, %v84_v1 }
  0x33   :  { %v133_v18 = vadd.f32 %v132_v14, %v70_v9  ;;  %v265_v20 = vadd.f32 %v264_v16, %v202_v11  ;;  %v86_v9 = vld [vmem:[#allocation2 + $0x120] sm:$0xff]  ;;  %v218_v11 = vmul.f32 %v85_v5, %v85_v5 }
  0x35   :  { %v134_v22 = vadd.f32 %v133_v18, %v71_v13  ;;  %v266_v24 = vadd.f32 %v265_v20, %v203_v15  ;;  %v87_v13 = vld [vmem:[#allocation2 + $0x128] sm:$0xff]  ;;  %v219_v15 = vmul.f32 %v86_v9, %v86_v9 }
  0x37   :  { %v135_v26 = vadd.f32 %v134_v22, %v72_v17  ;;  %v267_v28 = vadd.f32 %v266_v24, %v204_v19  ;;  %v88_v17 = vld [vmem:[#allocation2 + $0x130] sm:$0xff]  ;;  %v220_v19 = vmul.f32 %v87_v13, %v87_v13 }
  0x39   :  { %v136_v30 = vadd.f32 %v135_v26, %v73_v21  ;;  %v268_v32 = vadd.f32 %v267_v28, %v205_v23  ;;  %v89_v21 = vld [vmem:[#allocation2 + $0x138] sm:$0xff]  ;;  %v221_v23 = vmul.f32 %v88_v17, %v88_v17 }
  0x3b   :  { %v137_v34 = vadd.f32 %v136_v30, %v74_v25  ;;  %v269_v36 = vadd.f32 %v268_v32, %v206_v27  ;;  %v90_v25 = vld [vmem:[#allocation2 + $0x140] sm:$0xff]  ;;  %v222_v27 = vmul.f32 %v89_v21, %v89_v21 }
  0x3d   :  { %v138_v38 = vadd.f32 %v137_v34, %v75_v29  ;;  %v270_v40 = vadd.f32 %v269_v36, %v207_v31  ;;  %v91_v29 = vld [vmem:[#allocation2 + $0x148] sm:$0xff]  ;;  %v223_v31 = vmul.f32 %v90_v25, %v90_v25 }
  0x3f   :  { %v139_v42 = vadd.f32 %v138_v38, %v76_v33  ;;  %v271_v44 = vadd.f32 %v270_v40, %v208_v35  ;;  %v92_v33 = vld [vmem:[#allocation2 + $0x150] sm:$0xff]  ;;  %v224_v35 = vmul.f32 %v91_v29, %v91_v29 }
  0x41   :  { %v140_v46 = vadd.f32 %v139_v42, %v77_v37  ;;  %v272_v48 = vadd.f32 %v271_v44, %v209_v39  ;;  %v93_v37 = vld [vmem:[#allocation2 + $0x158] sm:$0xff]  ;;  %v225_v39 = vmul.f32 %v92_v33, %v92_v33 }
  0x43   :  { %v141_v50 = vadd.f32 %v140_v46, %v78_v41  ;;  %v273_v52 = vadd.f32 %v272_v48, %v210_v43  ;;  %v94_v41 = vld [vmem:[#allocation2 + $0x160] sm:$0xff]  ;;  %v226_v43 = vmul.f32 %v93_v37, %v93_v37 }
  0x45   :  { %v142_v54 = vadd.f32 %v141_v50, %v79_v45  ;;  %v274_v56 = vadd.f32 %v273_v52, %v211_v47  ;;  %v95_v45 = vld [vmem:[#allocation2 + $0x168] sm:$0xff]  ;;  %v227_v47 = vmul.f32 %v94_v41, %v94_v41 }
  0x47   :  { %v143_v58 = vadd.f32 %v142_v54, %v80_v49  ;;  %v275_v60 = vadd.f32 %v274_v56, %v212_v51  ;;  %v96_v49 = vld [vmem:[#allocation2 + $0x170] sm:$0xff]  ;;  %v228_v51 = vmul.f32 %v95_v45, %v95_v45 }
  0x49   :  { %v144_v62 = vadd.f32 %v143_v58, %v81_v53  ;;  %v276_v0 = vadd.f32 %v275_v60, %v213_v55  ;;  %v97_v53 = vld [vmem:[#allocation2 + $0x178] sm:$0xff]  ;;  %v229_v55 = vmul.f32 %v96_v49, %v96_v49 }
  0x4b   :  { %v145_v2 = vadd.f32 %v144_v62, %v82_v57  ;;  %v277_v4 = vadd.f32 %v276_v0, %v214_v59  ;;  %v98_v57 = vld [vmem:[#allocation2 + $0x180] sm:$0xff]  ;;  %v230_v59 = vmul.f32 %v97_v53, %v97_v53 }
  0x4d   :  { %v146_v6 = vadd.f32 %v145_v2, %v83_v61  ;;  %v278_v8 = vadd.f32 %v277_v4, %v215_v63  ;;  %v99_v61 = vld [vmem:[#allocation2 + $0x188] sm:$0xff]  ;;  %v231_v63 = vmul.f32 %v98_v57, %v98_v57 }
  0x4f   :  { %v147_v10 = vadd.f32 %v146_v6, %v84_v1  ;;  %v279_v12 = vadd.f32 %v278_v8, %v216_v3  ;;  %v100_v1 = vld [vmem:[#allocation2 + $0x190] sm:$0xff]  ;;  %v232_v3 = vmul.f32 %v99_v61, %v99_v61 }
  0x51   :  { %v148_v14 = vadd.f32 %v147_v10, %v85_v5  ;;  %v280_v16 = vadd.f32 %v279_v12, %v217_v7  ;;  %v101_v5 = vld [vmem:[#allocation2 + $0x198] sm:$0xff]  ;;  %v233_v7 = vmul.f32 %v100_v1, %v100_v1 }
  0x53   :  { %v149_v18 = vadd.f32 %v148_v14, %v86_v9  ;;  %v281_v20 = vadd.f32 %v280_v16, %v218_v11  ;;  %v102_v9 = vld [vmem:[#allocation2 + $0x1a0] sm:$0xff]  ;;  %v234_v11 = vmul.f32 %v101_v5, %v101_v5 }
  0x55   :  { %v150_v22 = vadd.f32 %v149_v18, %v87_v13  ;;  %v282_v24 = vadd.f32 %v281_v20, %v219_v15  ;;  %v103_v13 = vld [vmem:[#allocation2 + $0x1a8] sm:$0xff]  ;;  %v235_v15 = vmul.f32 %v102_v9, %v102_v9 }
  0x57   :  { %v151_v26 = vadd.f32 %v150_v22, %v88_v17  ;;  %v283_v28 = vadd.f32 %v282_v24, %v220_v19  ;;  %v104_v17 = vld [vmem:[#allocation2 + $0x1b0] sm:$0xff]  ;;  %v236_v19 = vmul.f32 %v103_v13, %v103_v13 }
  0x59   :  { %v152_v30 = vadd.f32 %v151_v26, %v89_v21  ;;  %v284_v32 = vadd.f32 %v283_v28, %v221_v23  ;;  %v105_v21 = vld [vmem:[#allocation2 + $0x1b8] sm:$0xff]  ;;  %v237_v23 = vmul.f32 %v104_v17, %v104_v17 }
  0x5b   :  { %v153_v34 = vadd.f32 %v152_v30, %v90_v25  ;;  %v285_v36 = vadd.f32 %v284_v32, %v222_v27  ;;  %v106_v25 = vld [vmem:[#allocation2 + $0x1c0] sm:$0xff]  ;;  %v238_v27 = vmul.f32 %v105_v21, %v105_v21 }
  0x5d   :  { %v154_v38 = vadd.f32 %v153_v34, %v91_v29  ;;  %v286_v40 = vadd.f32 %v285_v36, %v223_v31  ;;  %v107_v29 = vld [vmem:[#allocation2 + $0x1c8] sm:$0xff]  ;;  %v239_v31 = vmul.f32 %v106_v25, %v106_v25 }
  0x5f   :  { %v155_v42 = vadd.f32 %v154_v38, %v92_v33  ;;  %v287_v44 = vadd.f32 %v286_v40, %v224_v35  ;;  %v108_v33 = vld [vmem:[#allocation2 + $0x1d0] sm:$0xff]  ;;  %v240_v35 = vmul.f32 %v107_v29, %v107_v29 }
  0x61   :  { %v156_v46 = vadd.f32 %v155_v42, %v93_v37  ;;  %v288_v48 = vadd.f32 %v287_v44, %v225_v39  ;;  %v109_v37 = vld [vmem:[#allocation2 + $0x1d8] sm:$0xff]  ;;  %v241_v39 = vmul.f32 %v108_v33, %v108_v33 }
  0x63   :  { %v157_v50 = vadd.f32 %v156_v46, %v94_v41  ;;  %v289_v52 = vadd.f32 %v288_v48, %v226_v43  ;;  %v110_v41 = vld [vmem:[#allocation2 + $0x1e0] sm:$0xff]  ;;  %v242_v43 = vmul.f32 %v109_v37, %v109_v37 }
  0x65   :  { %v158_v54 = vadd.f32 %v157_v50, %v95_v45  ;;  %v290_v56 = vadd.f32 %v289_v52, %v227_v47  ;;  %v111_v45 = vld [vmem:[#allocation2 + $0x1e8] sm:$0xff]  ;;  %v243_v47 = vmul.f32 %v110_v41, %v110_v41 }
  0x67   :  { %v159_v58 = vadd.f32 %v158_v54, %v96_v49  ;;  %v291_v60 = vadd.f32 %v290_v56, %v228_v51  ;;  %v112_v49 = vld [vmem:[#allocation2 + $0x1f0] sm:$0xff]  ;;  %v244_v51 = vmul.f32 %v111_v45, %v111_v45 }
  0x69   :  { %v160_v62 = vadd.f32 %v159_v58, %v97_v53  ;;  %v292_v0 = vadd.f32 %v291_v60, %v229_v55  ;;  %v113_v53 = vld [vmem:[#allocation2 + $0x1f8] sm:$0xff]  ;;  %v245_v55 = vmul.f32 %v112_v49, %v112_v49 }
  0x6a   :  { %v246_v58 = vmul.f32 %v113_v53, %v113_v53 }
  0x6b   :  { %v161_v2 = vadd.f32 %v160_v62, %v98_v57  ;;  %v293_v4 = vadd.f32 %v292_v0, %v230_v59 }
  0x6d   :  { %v162_v6 = vadd.f32 %v161_v2, %v99_v61  ;;  %v294_v8 = vadd.f32 %v293_v4, %v231_v63  ;;  %v471_v61 = vmov 512.0  }
  0x6e   :  { %384 = vrcp.f32 %v471_v61 }
  0x6f   :  { %v163_v10 = vadd.f32 %v162_v6, %v100_v1  ;;  %v295_v12 = vadd.f32 %v294_v8, %v232_v3 }
  0x71   :  { %v164_v14 = vadd.f32 %v163_v10, %v101_v5  ;;  %v296_v16 = vadd.f32 %v295_v12, %v233_v7 }
  0x73   :  { %v165_v18 = vadd.f32 %v164_v14, %v102_v9  ;;  %v297_v20 = vadd.f32 %v296_v16, %v234_v11 }
  0x74   :  { %v385_v3 = vpop.eup %384 }
  0x75   :  { %v166_v22 = vadd.f32 %v165_v18, %v103_v13  ;;  %v298_v24 = vadd.f32 %v297_v20, %v235_v15  ;;  %v326_v8 = vmul.f32 512.0, %v385_v3  ;;  %v316_v15 = vld [vmem:[#allocation7] sm:$0x3]  ;;  %vm330_vm1 = vweird.f32 %v385_v3 }
  0x77   :  { %v167_v26 = vadd.f32 %v166_v22, %v104_v17  ;;  %v299_v28 = vadd.f32 %v298_v24, %v236_v19  ;;  %v327_v13 = vsub.f32 1.0, %v326_v8 }
  0x79   :  { %v168_v30 = vadd.f32 %v167_v26, %v105_v21  ;;  %v300_v32 = vadd.f32 %v299_v28, %v237_v23  ;;  %v328_v17 = vmul.f32 %v385_v3, %v327_v13 }
  0x7b   :  { %v169_v34 = vadd.f32 %v168_v30, %v106_v25  ;;  %v301_v36 = vadd.f32 %v300_v32, %v238_v27  ;;  %v329_v19 = vadd.f32 %v385_v3, %v328_v17 }
  0x7d   :  { %v170_v38 = vadd.f32 %v169_v34, %v107_v29  ;;  %v302_v40 = vadd.f32 %v301_v36, %v239_v31  ;;  %v331_v20 = vsel %vm330_vm1, %v385_v3, %v329_v19 }
  0x7f   :  { %v171_v42 = vadd.f32 %v170_v38, %v108_v33  ;;  %v303_v44 = vadd.f32 %v302_v40, %v240_v35  ;;  %v349_v35 = vld [vmem:[#allocation5] sm:$0x1] }
  0x80   :  { %v351_v38 = vld [vmem:[%s509_s2] sm:$0x1] }
  0x81   :  { %v172_v46 = vadd.f32 %v171_v42, %v109_v37  ;;  %v304_v48 = vadd.f32 %v303_v44, %v241_v39 }
  0x83   :  { %v173_v50 = vadd.f32 %v172_v46, %v110_v41  ;;  %v305_v52 = vadd.f32 %v304_v48, %v242_v43 }
  0x85   :  { %v174_v54 = vadd.f32 %v173_v50, %v111_v45  ;;  %v306_v56 = vadd.f32 %v305_v52, %v243_v47 }
  0x87   :  { %v175_v57 = vadd.f32 %v174_v54, %v112_v49  ;;  %v307_v59 = vadd.f32 %v306_v56, %v244_v51 }
  0x89   :  { %v176_v60 = vadd.f32 %v175_v57, %v113_v53  ;;  %v308_v62 = vadd.f32 %v307_v59, %v245_v55 }
  0x8b   :  { %v177_v63 = vrot.slane %v176_v60, 4  ;;  %v309_v0 = vadd.f32 %v308_v62, %v246_v58 }
  0x8d   :  { %v178_v1 = vadd.f32 %v177_v63, %v176_v60  ;;  %v310_v2 = vrot.slane %v309_v0, 4 }
  0x8f   :  { %v179_v4 = vrot.slane %v178_v1, 2  ;;  %v311_v5 = vadd.f32 %v310_v2, %v309_v0 }
  0x91   :  { %v180_v6 = vadd.f32 %v179_v4, %v178_v1  ;;  %v312_v7 = vrot.slane %v311_v5, 2 }
  0x93   :  { %v181_v9 = vrot.slane %v180_v6, 1  ;;  %v313_v10 = vadd.f32 %v312_v7, %v311_v5 }
  0x95   :  { %v182_v11 = vadd.f32 %v181_v9, %v180_v6  ;;  %v314_v12 = vrot.slane %v313_v10, 1 }
  0x97   :  { %v315_v14 = vadd.f32 %v314_v12, %v313_v10 }
  0x99   :  { %v318_v16 = vsel %vm317_vm0, %v182_v11, %v315_v14 }
  0x9a   :  { %v319_v18 = vadd.f32 %v318_v16, %v316_v15 }
  0x9c   :  { %320 = vst [vmem:[#allocation7] sm:$0x3] %v319_v18 }
  0xa3   :  { %v324_v21 = vld [vmem:[#allocation7] sm:$0x1]  ;;  %v333_v22 = vld [vmem:[#allocation7 + $0x1] sm:$0x1] }
  0xa4   :  { %v332_v23 = vmul.f32 %v331_v20, %v324_v21  ;;  %v334_v24 = vmul.f32 %v333_v22, %v331_v20 }
  0xa6   :  { %v335_v25 = vmul.f32 %v332_v23, %v332_v23 }
  0xa8   :  { %v336_v26 = vsub.f32 %v334_v24, %v335_v25 }
  0xaa   :  { %v337_v27 = vmax.f32 %v336_v26, 0.0 }
  0xac   :  { %v338_v28 = vadd.f32 1e-05, %v337_v27 }
  0xae   :  { %386 = vrsqrt.f32 %v338_v28  ;;  %vm345_vm3 = vweird.f32 %v338_v28 }
  0xb4   :  { %v387_v29 = vpop.eup %386 }
  0xb5   :  { %v340_v30 = vmul.f32 %v387_v29, %v338_v28  ;;  %vm346_vm2 = vweird.f32 %v387_v29 }
  0xb6   :  { %vm347_vm4 = vmor %vm345_vm3, %vm346_vm2 }
  0xb7   :  { %v341_v31 = vmul.f32 %v387_v29, %v340_v30 }
  0xb9   :  { %v342_v32 = vmul.f32 0.5, %v341_v31 }
  0xbb   :  { %v343_v33 = vsub.f32 1.5, %v342_v32 }
  0xbd   :  { %v344_v34 = vmul.f32 %v387_v29, %v343_v33 }
  0xbf   :  { %v348_v36 = vsel %vm347_vm4, %v387_v29, %v344_v34 }
  0xc0   :  { %v350_v37 = vmul.f32 %v349_v35, %v348_v36 }
  0xc2   :  { %v352_v39 = vmul.f32 %v350_v37, %v332_v23 }
  0xc4   :  { %v353_v40 = vsub.f32 %v351_v38, %v352_v39 }
  0xc6   :  { %v355_v41 = vperm.slane %v353_v40, 0 }
  0xc8   :  { %v357_v42 = vsel %vm317_vm0, %v350_v37, %v355_v41 }
  0xc9   :  { %358 = vst [vmem:[#allocation7] sm:$0x3] %v357_v42 }
  0xca   :  { %369 = dma.vmem_to_hbm [thread:$0]  %s365_s25, 32, %s367_s28, [#allocation4]  }
  0xcb   :  { %464 = dma.done.wait [#allocation4], 32  }
  0xcc   :  { %465 = vsyncadd [#allocation4], 4294967264 }
  0xcd   :  { %374 = vsyncpa [#allocation3], 1 }
  0xce   :  { %375 = vsyncpa [#allocation6], 1 }
  0xcf   :  { %376 = vsyncpa [#allocation4], 1 }

</bundles_post_ra>
